<compile_context>
chip_gen: v5e
topology: v5e:2x2
jax: 0.10.0
libtpu: 0.0.40
codegen_flags: <defaults>
</compile_context>

<pallas_src>
import jax
import jax.numpy as jnp
from jax.experimental import pallas as pl
from jax.experimental.pallas import tpu as pltpu

LANE = 128


def _round_up(x, m):
    return ((x + m - 1) // m) * m


def _sublane(itemsize):
    return {4: 8, 2: 16, 1: 32}.get(itemsize, 8)


def _working_set_bytes(th, W, Cin, Cout, itemsize):
    """VMEM footprint estimate with (sublane, 128)-tile padding applied."""
    sub = _sublane(itemsize)
    r8 = lambda v: _round_up(max(v, 1), sub)
    r128 = lambda v: _round_up(max(v, 1), LANE)
    tm = th * W
    c2 = 2 * Cout
    x_blk = r8(Cin) * r128(tm) * itemsize                # (1, Cin, tm)
    o_blk = th * 2 * r8(W) * r128(c2) * itemsize         # (1, th, 2, W, 2*Cout)
    w_blk = 2 * r8(Cin) * r128(c2) * itemsize            # (2, Cin, 2*Cout)
    b_blk = r8(1) * r128(c2) * itemsize                  # (1, 2*Cout)
    pipeline = 2 * (x_blk + o_blk + w_blk + b_blk)       # double-buffered
    interm = 4 * tm * r128(c2) * 4                       # f32 acc tiles / relayouts
    return pipeline + interm


def _choose_th(N, H, W, Cin, Cout, itemsize, *, tm_max, vmem_budget, min_steps=2):
    """Pick the h-tile height: largest divisor of H that is DMA-legal
    ((th*W) % 128 == 0 or th == H), fits the padded VMEM budget, keeps
    tm = th*W <= tm_max, and (when possible) yields >= min_steps grid steps."""
    divisors = [d for d in range(H, 0, -1) if H % d == 0]

    def legal(th):
        return (th * W) % LANE == 0 or th == H

    def fits(th):
        return _working_set_bytes(th, W, Cin, Cout, itemsize) <= vmem_budget

    cands = [d for d in divisors if legal(d) and fits(d)]
    if not cands:
        # Fall back to the always-legal full extent; vmem_limit is sized from
        # the real working set below, so this fails loudly rather than silently.
        return H
    small_enough = [d for d in cands if d * W <= tm_max]
    pool = small_enough if small_enough else [min(cands)]
    multi = [d for d in pool if N * (H // d) >= min_steps]
    pool = multi if multi else pool
    return max(pool)


def _green_block_kernel(x_ref, w_ref, b_ref, o_ref):
    # x_ref: (1, Cin, tm)           -- native-layout activation slab (lane-dense)
    # w_ref: (2, Cin, 2*Cout)       -- [kh, Cin, (kw, Cout)]
    # b_ref: (1, 2*Cout)            -- bias tiled over kw
    # o_ref: (1, th, 2, W, 2*Cout)  -- free view of NHWC output rows 2h+kh
    th = o_ref.shape[1]
    W = o_ref.shape[3]
    c2 = o_ref.shape[4]

    x_t = x_ref[0]                         # (Cin, tm)
    bias = b_ref[...].astype(jnp.float32)  # (1, 2*Cout)

    for kh in range(2):
        acc = jax.lax.dot_general(
            x_t, w_ref[kh],
            dimension_numbers=(((0,), (0,)), ((), ())),
            preferred_element_type=jnp.float32,
        )                                  # (tm, 2*Cout), f32 accumulate on MXU
        acc = acc + bias
        # Split the row axis (tm = th*W) into (th, W); lane dim unchanged, so
        # this is a layout-friendly reshape (free when W % 8 == 0).
        o_ref[0, :, kh, :, :] = acc.reshape(th, W, c2).astype(o_ref.dtype)


def green_block_forward(x, weight, bias, *, tm_max=8192):
    """ConvTranspose2d(k=2, s=2, p=0) forward.

    x:      [N, Cin, H, W]    (NCHW, like PyTorch)
    weight: [Cin, Cout, 2, 2] (PyTorch ConvTranspose2d layout)
    bias:   [Cout]
    returns [N, Cout, 2H, 2W]
    """
    N, Cin, H, W = x.shape
    Cout = weight.shape[1]
    dtype = x.dtype
    itemsize = jnp.dtype(dtype).itemsize
    c2 = 2 * Cout

    # Generation-aware VMEM capacity (v7x: 64 MiB/TC, v5e/v6e: 128 MiB).
    try:
        vmem_cap = int(pltpu.get_tpu_info().vmem_capacity_bytes)
    except Exception:
        vmem_cap = 64 * 1024 * 1024  # conservative: safe on every generation
    search_budget = int(0.4 * vmem_cap)

    th = _choose_th(N, H, W, Cin, Cout, itemsize,
                    tm_max=tm_max, vmem_budget=search_budget, min_steps=2)
    tm = th * W
    grid = (N, H // th)

    # ---- free-view glue (no data movement) ----
    x_flat = x.reshape(N, Cin, H * W)                                  # NCHW view
    # weight [Cin, Cout, kh, kw] -> [kh, Cin, (kw, Cout)]
    w_r = jnp.transpose(weight, (2, 0, 3, 1)).reshape(2, Cin, c2).astype(dtype)
    b_r = jnp.tile(bias, (2,)).reshape(1, c2).astype(dtype)            # (kw, Cout) order

    wset = _working_set_bytes(th, W, Cin, Cout, itemsize)
    vmem_limit = int(min(int(0.75 * vmem_cap),
                         max(32 * 1024 * 1024, 2 * wset)))

    flops = 2 * N * H * W * Cin * 4 * Cout
    bytes_accessed = itemsize * (N * Cin * H * W        # read x
                                 + 4 * N * Cout * H * W  # write y
                                 + 4 * Cin * Cout + 2 * Cout)

    out = pl.pallas_call(
        _green_block_kernel,
        out_shape=jax.ShapeDtypeStruct((N, H, 2, W, c2), dtype),
        grid=grid,
        in_specs=[
            pl.BlockSpec((1, Cin, tm), lambda n, h: (n, 0, h)),
            pl.BlockSpec((2, Cin, c2), lambda n, h: (0, 0, 0)),   # resident weight
            pl.BlockSpec((1, c2), lambda n, h: (0, 0)),           # resident bias
        ],
        out_specs=pl.BlockSpec((1, th, 2, W, c2), lambda n, h: (n, h, 0, 0, 0)),
        compiler_params=pltpu.CompilerParams(
            dimension_semantics=("parallel", "parallel"),
            vmem_limit_bytes=vmem_limit,
        ),
        cost_estimate=pl.CostEstimate(flops=flops, transcendentals=0,
                                      bytes_accessed=bytes_accessed),
    )(x_flat, w_r, b_r)

    # [N, H, 2, W, 2*Cout] is a free view of NHWC [N, 2H, 2W, Cout].
    y_nhwc = out.reshape(N, 2 * H, 2 * W, Cout)
    # TODO(synk): keep NHWC if the surrounding model is NHWC; this transpose is
    # the only remaining extra HBM pass and exists solely to match PyTorch NCHW.
    return jnp.transpose(y_nhwc, (0, 3, 1, 2))


def _reference(x, weight, bias):
    # pure-JAX reference of ConvTranspose2d(k=2, s=2, p=0)
    taps = jnp.einsum("nchw,cokl->nohwkl", x, weight)  # [N,Cout,H,W,kh,kw]
    N, Cout, H, W = taps.shape[:4]
    y = jnp.transpose(taps, (0, 1, 2, 4, 3, 5)).reshape(N, Cout, 2 * H, 2 * W)
    return y + bias[None, :, None, None]


if __name__ == "__main__":
    key = jax.random.PRNGKey(0)
    k_x, k_w, k_b = jax.random.split(key, 3)

    N, Cin, Cout, H, W = 2, 4, 8, 16, 16
    x = jax.random.normal(k_x, (N, Cin, H, W), dtype=jnp.float32)
    # PyTorch ConvTranspose2d weight layout: [in_planes, out_planes, 2, 2]
    weight = jax.random.normal(k_w, (Cin, Cout, 2, 2), dtype=jnp.float32) * 0.1
    bias = jax.random.normal(k_b, (Cout,), dtype=jnp.float32) * 0.1

    out = green_block_forward(x, weight, bias)
    out = jax.block_until_ready(out)

    ref = _reference(x, weight, bias)
    assert out.shape == (N, Cout, 2 * H, 2 * W), out.shape
    assert jnp.allclose(out, ref, atol=1e-5, rtol=1e-5), float(
        jnp.max(jnp.abs(out - ref))
    )
    print("KERNEL_OK")
</pallas_src>

<mosaic_0001>
module attributes {stable_mosaic.version = 11 : i64} {
  func.func @_green_block_kernel(%arg0: i32, %arg1: i32, %arg2: memref<1x4x256xf32, #tpu.memory_space<vmem>>, %arg3: memref<2x4x16xf32, #tpu.memory_space<vmem>>, %arg4: memref<1x16xf32, #tpu.memory_space<vmem>>, %arg5: memref<1x16x2x16x16xf32, #tpu.memory_space<vmem>>) attributes {dimension_semantics = [#tpu.dimension_semantics<parallel>, #tpu.dimension_semantics<parallel>], iteration_bounds = array<i64: 2, 1>, scalar_prefetch = 0 : i64, scratch_operands = 0 : i64, tpu.core_type = #tpu.core_type<tc>, window_params = [{transform_indices = @transform_0, window_bounds = array<i64: 1, 4, 256>}, {pipeline_mode = #tpu.pipeline_mode<synchronous>, transform_indices = @transform_1, window_bounds = array<i64: 2, 4, 16>}, {pipeline_mode = #tpu.pipeline_mode<synchronous>, transform_indices = @transform_2, window_bounds = array<i64: 1, 16>}, {transform_indices = @transform_3, window_bounds = array<i64: 1, 16, 2, 16, 16>}]} {
    %c0 = arith.constant 0 : index
    %c0_0 = arith.constant 0 : index
    %c0_1 = arith.constant 0 : index
    %0 = vector.load %arg2[%c0, %c0_0, %c0_1] : memref<1x4x256xf32, #tpu.memory_space<vmem>>, vector<1x4x256xf32>
    %1 = vector.shape_cast %0 : vector<1x4x256xf32> to vector<4x256xf32>
    %c0_2 = arith.constant 0 : index
    %c0_3 = arith.constant 0 : index
    %2 = vector.load %arg4[%c0_2, %c0_3] : memref<1x16xf32, #tpu.memory_space<vmem>>, vector<1x16xf32>
    %c0_4 = arith.constant 0 : index
    %c0_5 = arith.constant 0 : index
    %c0_6 = arith.constant 0 : index
    %3 = vector.load %arg3[%c0_4, %c0_5, %c0_6] : memref<2x4x16xf32, #tpu.memory_space<vmem>>, vector<1x4x16xf32>
    %4 = vector.shape_cast %3 : vector<1x4x16xf32> to vector<4x16xf32>
    %cst = arith.constant dense<0.000000e+00> : vector<256x16xf32>
    %5 = tpu.matmul %1, %4, %cst {dimension_numbers = #tpu.dot_dimension_numbers<[0], [0], [1], [1], [0, 1, 1, 1], [], []>} : vector<4x256xf32>, vector<4x16xf32>, vector<256x16xf32> -> vector<256x16xf32>
    %6 = vector.broadcast %2 : vector<1x16xf32> to vector<256x16xf32>
    %7 = arith.addf %5, %6 : vector<256x16xf32>
    %8 = vector.shape_cast %7 : vector<256x16xf32> to vector<16x16x16xf32>
    %c0_7 = arith.constant 0 : index
    %c0_8 = arith.constant 0 : index
    %c0_9 = arith.constant 0 : index
    %c0_10 = arith.constant 0 : index
    %c0_11 = arith.constant 0 : index
    %9 = vector.load %arg5[%c0_7, %c0_8, %c0_9, %c0_10, %c0_11] : memref<1x16x2x16x16xf32, #tpu.memory_space<vmem>>, vector<1x16x1x16x16xf32>
    %10 = vector.shape_cast %9 : vector<1x16x1x16x16xf32> to vector<16x16x16xf32>
    %11 = vector.shape_cast %8 : vector<16x16x16xf32> to vector<1x16x1x16x16xf32>
    tpu.vector_store %arg5[%c0_7, %c0_8, %c0_9, %c0_10, %c0_11], %11 {strides = array<i32>} : memref<1x16x2x16x16xf32, #tpu.memory_space<vmem>>, vector<1x16x1x16x16xf32>,
    %c1 = arith.constant 1 : index
    %c0_12 = arith.constant 0 : index
    %c0_13 = arith.constant 0 : index
    %12 = vector.load %arg3[%c1, %c0_12, %c0_13] : memref<2x4x16xf32, #tpu.memory_space<vmem>>, vector<1x4x16xf32>
    %13 = vector.shape_cast %12 : vector<1x4x16xf32> to vector<4x16xf32>
    %cst_14 = arith.constant dense<0.000000e+00> : vector<256x16xf32>
    %14 = tpu.matmul %1, %13, %cst_14 {dimension_numbers = #tpu.dot_dimension_numbers<[0], [0], [1], [1], [0, 1, 1, 1], [], []>} : vector<4x256xf32>, vector<4x16xf32>, vector<256x16xf32> -> vector<256x16xf32>
    %15 = vector.broadcast %2 : vector<1x16xf32> to vector<256x16xf32>
    %16 = arith.addf %14, %15 : vector<256x16xf32>
    %17 = vector.shape_cast %16 : vector<256x16xf32> to vector<16x16x16xf32>
    %c0_15 = arith.constant 0 : index
    %c0_16 = arith.constant 0 : index
    %c1_17 = arith.constant 1 : index
    %c0_18 = arith.constant 0 : index
    %c0_19 = arith.constant 0 : index
    %18 = vector.load %arg5[%c0_15, %c0_16, %c1_17, %c0_18, %c0_19] : memref<1x16x2x16x16xf32, #tpu.memory_space<vmem>>, vector<1x16x1x16x16xf32>
    %19 = vector.shape_cast %18 : vector<1x16x1x16x16xf32> to vector<16x16x16xf32>
    %20 = vector.shape_cast %17 : vector<16x16x16xf32> to vector<1x16x1x16x16xf32>
    tpu.vector_store %arg5[%c0_15, %c0_16, %c1_17, %c0_18, %c0_19], %20 {strides = array<i32>} : memref<1x16x2x16x16xf32, #tpu.memory_space<vmem>>, vector<1x16x1x16x16xf32>,
    return
  }
  func.func @transform_0(%arg0: i32, %arg1: i32) -> (i32, i32, i32) {
    %c0_i32 = arith.constant 0 : i32
    %c0_i32_0 = arith.constant 0 : i32
    return %arg0, %c0_i32, %arg1 : i32, i32, i32
  }
  func.func @transform_1(%arg0: i32, %arg1: i32) -> (i32, i32, i32) {
    %c0_i32 = arith.constant 0 : i32
    %c0_i32_0 = arith.constant 0 : i32
    %c0_i32_1 = arith.constant 0 : i32
    %c0_i32_2 = arith.constant 0 : i32
    return %c0_i32, %c0_i32_0, %c0_i32_1 : i32, i32, i32
  }
  func.func @transform_2(%arg0: i32, %arg1: i32) -> (i32, i32) {
    %c0_i32 = arith.constant 0 : i32
    %c0_i32_0 = arith.constant 0 : i32
    %c0_i32_1 = arith.constant 0 : i32
    return %c0_i32, %c0_i32_0 : i32, i32
  }
  func.func @transform_3(%arg0: i32, %arg1: i32) -> (i32, i32, i32, i32, i32) {
    %c0_i32 = arith.constant 0 : i32
    %c0_i32_0 = arith.constant 0 : i32
    %c0_i32_1 = arith.constant 0 : i32
    %c0_i32_2 = arith.constant 0 : i32
    return %arg0, %arg1, %c0_i32, %c0_i32_0, %c0_i32_1 : i32, i32, i32, i32, i32
  }
}

</mosaic_0001>

<bundles_post_ra>
// kernel: tpu_custom_call.1
= control target key start
LH: loop header
LB: loop body
LE: loop exit
PB: predicated region body
PF: predicated region fallthrough
CT: control target
= control target key end

     0   :  { %8 = vsyncpa [#allocation3], 0  ;;  %s1595_s0 = inlined_call_operand.hbm [shape: f32[2,4,256], index: 0, kind: input, shape index: {}]   ;;  %s1596_s1 = inlined_call_operand.hbm [shape: f32[2,4,16], index: 1, kind: input, shape index: {}]   ;;  %s1597_s2 = inlined_call_operand.vmem [shape: f32[1,16], index: 2, kind: input, shape index: {}]   ;;  %s1598_s3 = inlined_call_operand.hbm [shape: f32[2,16,2,16,16], index: 3, kind: output, shape index: {}]  }
   0x1   :  { %10 = vsyncpa [#allocation3 + $0x1], 0 }
   0x2   :  { %11 = vsyncpa [#allocation6], 0 }
   0x3   :  { %12 = vsyncpa [#allocation4], 0 }
   0x4   :  { %14 = vsyncpa [#allocation4 + $0x1], 0  ;;  %s1187_s12 = smov 0   ;;  %s1189_s13 = smov 0  }
   0x5   :  { %s1191_s14 = smov 0   ;;  %s1193_s15 = smov 0  }
   0x6   :  { %s1195_s16 = smov 0   ;;  %s1197_s17 = smov 0  }
   0x7 LB: > { %s816_s18 = sadd.s32 4294967295, %s1160_s17   ;;  %p818_p0 = scmp.ge.s32.totalorder %s1160_s17, 1  ;;  %s1160_s17 = sphi %s1197_s17, %s20_s17   ;;  %s1156_s16 = sphi %s1195_s16, %s1609_s16   ;;  %s1152_s15 = sphi %s1193_s15, %s1608_s15   ;;  %s1148_s14 = sphi %s1191_s14, %s1607_s14   ;;  %s1144_s13 = sphi %s1189_s13, %s1606_s13   ;;  %s1140_s12 = sphi %s1187_s12, %s1605_s12  }
   0x8   : > { %p1219_p1 = scmp.eq.s32.totalorder %s816_s18, 0  ;;  %p135_p2 = scmp.lt.s32.totalorder %s1160_s17, 3 }
   0x9   : > { %s146_s22 = sshll.u32 %s1596_s1, 4  ;;  %s1162_s24 = smov [#allocation5]   ;;  %s147_s22 = int_to_ptr.hbm [resolvable:$true] %s146_s22 }
   0xa   : > { %p1227_p3 = pnand %p818_p0, %p135_p2  ;;  %s148_s25 = sshll.u32 %s1162_s24, 4  ;;  %s149_s25 = int_to_ptr.vmem [resolvable:$true] %s148_s25 }
   0xb   : > { %p820_p6 = scmp.ge.s32.totalorder %s1160_s17, 2  ;;  %s1163_s26 = smov 64  }
   0xc   : > { %p943_p4 = pneg %p1227_p3  ;;  %s1164_s27 = smov 4  }
   0xd   : > { %s817_s28 = sadd.s32 4294967294, %s1160_s17   ;;  %s32_s29 = sadd.s32 1, %s1156_s16 }
   0xe   : > { %p944_p5 = pnand %p943_p4, %p1219_p1  ;;  %s41_s30 = sadd.s32 1, %s1148_s14 }
   0xf   : > { %p34_p7 = scmp.ge.s32.totalorder %s32_s29, 2  ;;  %p48_p8 = scmp.ne.s32.totalorder %s1148_s14, %s1144_s13 }
  0x10   : > { %946 = dma.hbm_to_vmem [thread:$0]  (!%p944_p5), %s147_s22, 128, %s149_s25, [#allocation6], %s1163_s26, %s1163_s26, %s1164_s27  }
  0x11   : > { %p49_p9 = scmp.eq.s32.totalorder %s1160_s17, 0  ;;  %p54_p10 = scmp.ne.s32.totalorder %s1144_s13, %s1140_s12 }
  0x12   : > { %s1611_s29 = smov (%p34_p7, %s32_s29), 0  ;;  %p122_p13 = scmp.eq.s32.totalorder %s816_s18, 1 }
  0x13   : > { %p1246_p11 = por %p49_p9, %p48_p8  ;;  %p1252_p12 = por %p1219_p1, %p54_p10 }
  0x14   : > { %s36_s6 = ssub.s32 %s1156_s16, %s1611_s29  ;;  %p128_p2 = scmp.eq.s32.totalorder %s817_s28, 1 }
  0x15   : > { %p39_p0 = scmp.eq.s32.totalorder %s36_s6, 0  ;;  %p1258_p4 = por %p122_p13, %p48_p8 }
  0x16   : > { %p956_p5 = scmp.lt.s32.totalorder %s1160_s17, 2  ;;  %p1266_p7 = por %p128_p2, %p54_p10 }
  0x17   : > { %s1264_s8 = scalar_select %p39_p0, %s1148_s14, %s41_s30  }
  0x18   : > { %s165_s10 = sand.u32 1, %s1148_s14   ;;  %s931_s20 = sshll.u32 %s1156_s16, 3 }
  0x19   : > { %s821_s11 = sshll.u32 %s165_s10, 3  ;;  %s176_s18 = scalar_lea.hbm %s1595_s0, %s931_s20 }
  0x1a   : > { %s169_s24 = scalar_lea.vmem [#allocation2], %s821_s11  ;;  %s178_s26 = sshll.u32 %s176_s18, 4  ;;  %s179_s26 = int_to_ptr.hbm [resolvable:$true] %s178_s26 }
  0x1b   : > { %s180_s25 = sshll.u32 %s169_s24, 4  ;;  %p948_p8 = pnand %p956_p5, %p1246_p11  ;;  %s181_s25 = int_to_ptr.vmem [resolvable:$true] %s180_s25 }
  0x1c   : > { %s166_s27 = scalar_lea.sflag [#allocation3], %s165_s10  ;;  %189 = sbr.rel (%p1227_p3) target bundleno = 591 (0x24f), region = 32 }
  0x1d   : > { %950 = dma.hbm_to_vmem [thread:$0]  (!%p948_p8), %s179_s26, 128, %s181_s25, %s166_s27  }
  0x1e   : > { %s1280_s28 = sand.u32 (!%p1227_p3), 1, %s1144_s13  }
  0x1f   : > { %s825_s30 = sshll.u32 (!%p1227_p3), %s1280_s28, 3  ;;  %s192_s6 = scalar_lea.sflag (!%p1227_p3), [#allocation3], %s1280_s28 }
  0x20   : > { %s195_s11 = scalar_lea.vmem (!%p1227_p3), [#allocation2], %s825_s30 }
  0x21   : > { %1127 = dma.done.wait (%p1252_p12), %s192_s6, 128  }
  0x22   : > { %1129 = vsyncadd (%p1252_p12), %s192_s6, 4294967168 }
  0x23   : > { %1131 = dma.done.wait (%p1219_p1), [#allocation6], 128  }
  0x24   : > { %1133 = vsyncadd (%p1219_p1), [#allocation6], 4294967168  ;;  %v226_v0 = vld [vmem:[%s195_s11] sm:$0xff]  ;;  %v228_v2 = vld [vmem:[#allocation5] sm:$0xf]  ;;  %vm399_vm0 = vcmask 1043456  }
  0x25   : > { %233 = vst [vmem:[#allocation1] ss:$2 sm:$0xff] %v226_v0  ;;  %v550_v3 = vld [vmem:[#allocation5 + $0x4] sm:$0xf]  ;;  %933 = vmatpush.msk.msra.mxu2 %vm399_vm0, %v228_v2  ;;  %828 = vmatpush.msk.msra.mxu0 %vm399_vm0, %v228_v2  ;;  %vm302_vm1 = vcmask 31744   ;;  %s827_s19 = sshll.u32 %s1280_s28, 9 }
  0x26   : > { %934 = vmatpush.msk.msra.mxu3 %vm399_vm0, %v550_v3  ;;  %861 = vmatpush.msk.msra.mxu1 %vm399_vm0, %v550_v3  ;;  %v1330_v22 = vld [vmem:[%s1597_s2] ss:$0 sm:$0xff]  ;;  %vm516_vm2 = vcmask 130048   ;;  %s1334_s5 = scalar_lea.vmem [#allocation7], %s827_s19  ;;  %s932_s10 = sshll.u32 %s1152_s15, 9 }
  0x27   : > { %s715_s22 = scalar_lea.hbm %s1598_s3, %s932_s10  ;;  %s716_s18 = sshll.u32 %s1334_s5, 4  ;;  %s717_s18 = int_to_ptr.vmem [resolvable:$true] %s716_s18 }
  0x28   : > { %s718_s24 = sshll.u32 %s715_s22, 4  ;;  %s701_s15 = scalar_lea.sflag [#allocation4], %s1280_s28  ;;  %s719_s24 = int_to_ptr.hbm [resolvable:$true] %s718_s24 }
  0x29   : > { %s1088_s25 = sshra.s32 %s719_s24, 4  ;;  %s1094_s6 = scalar_lea.hbm %s1598_s3, 1024  ;;  %s1089_s25 = int_to_ptr.hbm [resolvable:$true] %s1088_s25 }
  0x2a   : > { %s1090_s26 = scalar_lea.hbm %s1089_s25, 512  ;;  %p1095_p10 = scmp.lt.s32.totalorder %s1089_s25, %s1598_s3 }
  0x2b   : > { %p1091_p1 = scmp.ne.s32.totalorder %s1089_s25, %s1090_s26  ;;  %p1096_p11 = scmp.lt.s32.totalorder %s1094_s6, %s1090_s26 }
  0x2c   : > { %v235_v1 = vld.sshfl [vmem:[#allocation1 + $0x8] sm:$0xff pattern:$0x75316420]  ;;  %v234_v4 = vld.sshfl [vmem:[#allocation1] sm:$0xff pattern:$0x75316420] }
  0x2d   : > { %270 = vxpose.xlu0.b32.start.end [1/1] (short) %v235_v1, 128  ;;  %p1092_p3 = pnand %p1091_p1, %p1258_p4  ;;  %p1097_p12 = por %p1096_p11, %p1095_p10 }
  0x2f   : > { %p1093_p9 = pneg %p1092_p3 }
  0x31   : > { %p1098_p13 = pnand %p1097_p12, %p1093_p9 }
  0xad   : > { %238 = vxpose.xlu0.b32.start.end [1/1] (short) %v234_v4, 128 }
  0xd1   : > { %v286_v5 = vpop.trf.xlu0 }
  0xd2   : > { %845 = vmatmul.msk.f32.vlgmr.msra.gmra.mxu2 %vm302_vm1, %v286_v5  ;;  %878 = vmatmul.msk.f32.vlgmr.msra.gmra.mxu3 %vm302_vm1, %v286_v5 }
  0xd9   : > { %v287_v6 = vpop.trf.xlu0 }
  0xda   : > { %846 = vmatmul.msk.f32.gmra.mxu2 %vm302_vm1, %v287_v6  ;;  %879 = vmatmul.msk.f32.gmra.mxu3 %vm302_vm1, %v287_v6 }
  0xe1   : > { %v288_v7 = vpop.trf.xlu0 }
  0xe2   : > { %847 = vmatmul.msk.f32.gmra.mxu2 %vm302_vm1, %v288_v7  ;;  %880 = vmatmul.msk.f32.gmra.mxu3 %vm302_vm1, %v288_v7 }
  0xe9   : > { %v289_v8 = vpop.trf.xlu0 }
  0xea   : > { %848 = vmatmul.msk.f32.gmra.mxu2 %vm302_vm1, %v289_v8  ;;  %881 = vmatmul.msk.f32.gmra.mxu3 %vm302_vm1, %v289_v8 }
  0xf1   : > { %v290_v9 = vpop.trf.xlu0 }
  0xf2   : > { %849 = vmatmul.msk.f32.gmra.mxu2 %vm302_vm1, %v290_v9  ;;  %882 = vmatmul.msk.f32.gmra.mxu3 %vm302_vm1, %v290_v9 }
  0xf9   : > { %v291_v10 = vpop.trf.xlu0 }
  0xfa   : > { %850 = vmatmul.msk.f32.gmra.mxu2 %vm302_vm1, %v291_v10  ;;  %883 = vmatmul.msk.f32.gmra.mxu3 %vm302_vm1, %v291_v10 }
 0x101   : > { %v292_v11 = vpop.trf.xlu0 }
 0x102   : > { %851 = vmatmul.msk.f32.gmra.mxu2 %vm302_vm1, %v292_v11  ;;  %884 = vmatmul.msk.f32.gmra.mxu3 %vm302_vm1, %v292_v11 }
 0x109   : > { %v293_v12 = vpop.trf.xlu0 }
 0x10a   : > { %852 = vmatmul.msk.f32.gmra.mxu2 %vm302_vm1, %v293_v12  ;;  %885 = vmatmul.msk.f32.gmra.mxu3 %vm302_vm1, %v293_v12 }
 0x111   : > { %v294_v13 = vpop.trf.xlu0 }
 0x112   : > { %853 = vmatmul.msk.f32.gmra.mxu2 %vm302_vm1, %v294_v13  ;;  %886 = vmatmul.msk.f32.gmra.mxu3 %vm302_vm1, %v294_v13 }
 0x119   : > { %v295_v14 = vpop.trf.xlu0 }
 0x11a   : > { %854 = vmatmul.msk.f32.gmra.mxu2 %vm302_vm1, %v295_v14  ;;  %887 = vmatmul.msk.f32.gmra.mxu3 %vm302_vm1, %v295_v14 }
 0x121   : > { %v296_v15 = vpop.trf.xlu0 }
 0x122   : > { %855 = vmatmul.msk.f32.gmra.mxu2 %vm302_vm1, %v296_v15  ;;  %888 = vmatmul.msk.f32.gmra.mxu3 %vm302_vm1, %v296_v15 }
 0x129   : > { %v297_v16 = vpop.trf.xlu0 }
 0x12a   : > { %856 = vmatmul.msk.f32.gmra.mxu2 %vm302_vm1, %v297_v16  ;;  %889 = vmatmul.msk.f32.gmra.mxu3 %vm302_vm1, %v297_v16 }
 0x131   : > { %v298_v17 = vpop.trf.xlu0 }
 0x132   : > { %857 = vmatmul.msk.f32.gmra.mxu2 %vm302_vm1, %v298_v17  ;;  %890 = vmatmul.msk.f32.gmra.mxu3 %vm302_vm1, %v298_v17 }
 0x139   : > { %v299_v18 = vpop.trf.xlu0 }
 0x13a   : > { %858 = vmatmul.msk.f32.gmra.mxu2 %vm302_vm1, %v299_v18  ;;  %891 = vmatmul.msk.f32.gmra.mxu3 %vm302_vm1, %v299_v18 }
 0x141   : > { %v300_v19 = vpop.trf.xlu0 }
 0x142   : > { %859 = vmatmul.msk.f32.gmra.mxu2 %vm302_vm1, %v300_v19  ;;  %892 = vmatmul.msk.f32.gmra.mxu3 %vm302_vm1, %v300_v19 }
 0x149   : > { %v301_v20 = vpop.trf.xlu0 }
 0x14a   : > { %860 = vmatmul.msk.f32.gmra.mxu2 %vm302_vm1, %v301_v20  ;;  %893 = vmatmul.msk.f32.gmra.mxu3 %vm302_vm1, %v301_v20 }
 0x151   : > { %v254_v21 = vpop.trf.xlu0 }
 0x152   : > { %829 = vmatmul.msk.f32.vlgmr.msra.gmra.mxu0 %vm302_vm1, %v254_v21  ;;  %862 = vmatmul.msk.f32.vlgmr.msra.gmra.mxu1 %vm302_vm1, %v254_v21 }
 0x155   : > { %v468_v23 = vpop.f32.mrf.mxu2  ;;  %v619_v24 = vpop.f32.mrf.mxu3 }
 0x156   : > { %v469_v25 = vadd.f32 %v1330_v22, %v468_v23  ;;  %v620_v26 = vadd.f32 %v1330_v22, %v619_v24 }
 0x158   : > { %533 = vst.msk [vmem:[%s1334_s5 + $0x100] sm:$0xff] %vm516_vm2, %v469_v25 }
 0x159   : > { %910 = vst.msk [vmem:[%s1334_s5 + $0x110] sm:$0xff] %vm516_vm2, %v620_v26  ;;  %v255_v27 = vpop.trf.xlu0 }
 0x15a   : > { %830 = vmatmul.msk.f32.gmra.mxu0 %vm302_vm1, %v255_v27  ;;  %863 = vmatmul.msk.f32.gmra.mxu1 %vm302_vm1, %v255_v27 }
 0x15d   : > { %v471_v28 = vpop.f32.mrf.mxu2  ;;  %v622_v29 = vpop.f32.mrf.mxu3 }
 0x15e   : > { %v472_v30 = vadd.f32 %v1330_v22, %v471_v28  ;;  %v623_v31 = vadd.f32 %v1330_v22, %v622_v29 }
 0x160   : > { %534 = vst.msk [vmem:[%s1334_s5 + $0x108] sm:$0xff] %vm516_vm2, %v472_v30 }
 0x161   : > { %911 = vst.msk [vmem:[%s1334_s5 + $0x118] sm:$0xff] %vm516_vm2, %v623_v31  ;;  %v256_v32 = vpop.trf.xlu0 }
 0x162   : > { %831 = vmatmul.msk.f32.gmra.mxu0 %vm302_vm1, %v256_v32  ;;  %864 = vmatmul.msk.f32.gmra.mxu1 %vm302_vm1, %v256_v32 }
 0x165   : > { %v474_v33 = vpop.f32.mrf.mxu2  ;;  %v625_v34 = vpop.f32.mrf.mxu3 }
 0x166   : > { %v475_v35 = vadd.f32 %v1330_v22, %v474_v33  ;;  %v626_v36 = vadd.f32 %v1330_v22, %v625_v34 }
 0x168   : > { %535 = vst.msk [vmem:[%s1334_s5 + $0x120] sm:$0xff] %vm516_vm2, %v475_v35 }
 0x169   : > { %912 = vst.msk [vmem:[%s1334_s5 + $0x130] sm:$0xff] %vm516_vm2, %v626_v36  ;;  %v257_v37 = vpop.trf.xlu0 }
 0x16a   : > { %832 = vmatmul.msk.f32.gmra.mxu0 %vm302_vm1, %v257_v37  ;;  %865 = vmatmul.msk.f32.gmra.mxu1 %vm302_vm1, %v257_v37 }
 0x16d   : > { %v477_v38 = vpop.f32.mrf.mxu2  ;;  %v628_v39 = vpop.f32.mrf.mxu3 }
 0x16e   : > { %v478_v40 = vadd.f32 %v1330_v22, %v477_v38  ;;  %v629_v41 = vadd.f32 %v1330_v22, %v628_v39 }
 0x170   : > { %536 = vst.msk [vmem:[%s1334_s5 + $0x128] sm:$0xff] %vm516_vm2, %v478_v40 }
 0x171   : > { %913 = vst.msk [vmem:[%s1334_s5 + $0x138] sm:$0xff] %vm516_vm2, %v629_v41  ;;  %v258_v42 = vpop.trf.xlu0 }
 0x172   : > { %833 = vmatmul.msk.f32.gmra.mxu0 %vm302_vm1, %v258_v42  ;;  %866 = vmatmul.msk.f32.gmra.mxu1 %vm302_vm1, %v258_v42 }
 0x175   : > { %v480_v43 = vpop.f32.mrf.mxu2  ;;  %v631_v44 = vpop.f32.mrf.mxu3 }
 0x176   : > { %v481_v45 = vadd.f32 %v1330_v22, %v480_v43  ;;  %v632_v46 = vadd.f32 %v1330_v22, %v631_v44 }
 0x178   : > { %537 = vst.msk [vmem:[%s1334_s5 + $0x140] sm:$0xff] %vm516_vm2, %v481_v45 }
 0x179   : > { %914 = vst.msk [vmem:[%s1334_s5 + $0x150] sm:$0xff] %vm516_vm2, %v632_v46  ;;  %v259_v47 = vpop.trf.xlu0 }
 0x17a   : > { %834 = vmatmul.msk.f32.gmra.mxu0 %vm302_vm1, %v259_v47  ;;  %867 = vmatmul.msk.f32.gmra.mxu1 %vm302_vm1, %v259_v47 }
 0x17d   : > { %v483_v48 = vpop.f32.mrf.mxu2  ;;  %v634_v49 = vpop.f32.mrf.mxu3 }
 0x17e   : > { %v484_v50 = vadd.f32 %v1330_v22, %v483_v48  ;;  %v635_v51 = vadd.f32 %v1330_v22, %v634_v49 }
 0x180   : > { %538 = vst.msk [vmem:[%s1334_s5 + $0x148] sm:$0xff] %vm516_vm2, %v484_v50 }
 0x181   : > { %915 = vst.msk [vmem:[%s1334_s5 + $0x158] sm:$0xff] %vm516_vm2, %v635_v51  ;;  %v260_v52 = vpop.trf.xlu0 }
 0x182   : > { %835 = vmatmul.msk.f32.gmra.mxu0 %vm302_vm1, %v260_v52  ;;  %868 = vmatmul.msk.f32.gmra.mxu1 %vm302_vm1, %v260_v52 }
 0x185   : > { %v486_v53 = vpop.f32.mrf.mxu2  ;;  %v637_v54 = vpop.f32.mrf.mxu3 }
 0x186   : > { %v487_v55 = vadd.f32 %v1330_v22, %v486_v53  ;;  %v638_v56 = vadd.f32 %v1330_v22, %v637_v54 }
 0x188   : > { %539 = vst.msk [vmem:[%s1334_s5 + $0x160] sm:$0xff] %vm516_vm2, %v487_v55 }
 0x189   : > { %916 = vst.msk [vmem:[%s1334_s5 + $0x170] sm:$0xff] %vm516_vm2, %v638_v56  ;;  %v261_v57 = vpop.trf.xlu0 }
 0x18a   : > { %836 = vmatmul.msk.f32.gmra.mxu0 %vm302_vm1, %v261_v57  ;;  %869 = vmatmul.msk.f32.gmra.mxu1 %vm302_vm1, %v261_v57 }
 0x18d   : > { %v489_v58 = vpop.f32.mrf.mxu2  ;;  %v640_v59 = vpop.f32.mrf.mxu3 }
 0x18e   : > { %v490_v60 = vadd.f32 %v1330_v22, %v489_v58  ;;  %v641_v61 = vadd.f32 %v1330_v22, %v640_v59 }
 0x190   : > { %540 = vst.msk [vmem:[%s1334_s5 + $0x168] sm:$0xff] %vm516_vm2, %v490_v60 }
 0x191   : > { %917 = vst.msk [vmem:[%s1334_s5 + $0x178] sm:$0xff] %vm516_vm2, %v641_v61  ;;  %v262_v62 = vpop.trf.xlu0 }
 0x192   : > { %837 = vmatmul.msk.f32.gmra.mxu0 %vm302_vm1, %v262_v62  ;;  %870 = vmatmul.msk.f32.gmra.mxu1 %vm302_vm1, %v262_v62 }
 0x195   : > { %v492_v63 = vpop.f32.mrf.mxu2  ;;  %v643_v0 = vpop.f32.mrf.mxu3 }
 0x196   : > { %v493_v1 = vadd.f32 %v1330_v22, %v492_v63  ;;  %v644_v2 = vadd.f32 %v1330_v22, %v643_v0 }
 0x198   : > { %541 = vst.msk [vmem:[%s1334_s5 + $0x180] sm:$0xff] %vm516_vm2, %v493_v1 }
 0x199   : > { %918 = vst.msk [vmem:[%s1334_s5 + $0x190] sm:$0xff] %vm516_vm2, %v644_v2  ;;  %v263_v3 = vpop.trf.xlu0 }
 0x19a   : > { %838 = vmatmul.msk.f32.gmra.mxu0 %vm302_vm1, %v263_v3  ;;  %871 = vmatmul.msk.f32.gmra.mxu1 %vm302_vm1, %v263_v3 }
 0x19d   : > { %v495_v4 = vpop.f32.mrf.mxu2  ;;  %v646_v5 = vpop.f32.mrf.mxu3 }
 0x19e   : > { %v496_v6 = vadd.f32 %v1330_v22, %v495_v4  ;;  %v647_v7 = vadd.f32 %v1330_v22, %v646_v5 }
 0x1a0   : > { %542 = vst.msk [vmem:[%s1334_s5 + $0x188] sm:$0xff] %vm516_vm2, %v496_v6 }
 0x1a1   : > { %919 = vst.msk [vmem:[%s1334_s5 + $0x198] sm:$0xff] %vm516_vm2, %v647_v7  ;;  %v264_v8 = vpop.trf.xlu0 }
 0x1a2   : > { %839 = vmatmul.msk.f32.gmra.mxu0 %vm302_vm1, %v264_v8  ;;  %872 = vmatmul.msk.f32.gmra.mxu1 %vm302_vm1, %v264_v8 }
 0x1a5   : > { %v498_v9 = vpop.f32.mrf.mxu2  ;;  %v649_v10 = vpop.f32.mrf.mxu3 }
 0x1a6   : > { %v499_v11 = vadd.f32 %v1330_v22, %v498_v9  ;;  %v650_v12 = vadd.f32 %v1330_v22, %v649_v10 }
 0x1a8   : > { %543 = vst.msk [vmem:[%s1334_s5 + $0x1a0] sm:$0xff] %vm516_vm2, %v499_v11 }
 0x1a9   : > { %920 = vst.msk [vmem:[%s1334_s5 + $0x1b0] sm:$0xff] %vm516_vm2, %v650_v12  ;;  %v265_v13 = vpop.trf.xlu0 }
 0x1aa   : > { %840 = vmatmul.msk.f32.gmra.mxu0 %vm302_vm1, %v265_v13  ;;  %873 = vmatmul.msk.f32.gmra.mxu1 %vm302_vm1, %v265_v13 }
 0x1ad   : > { %v501_v14 = vpop.f32.mrf.mxu2  ;;  %v652_v15 = vpop.f32.mrf.mxu3 }
 0x1ae   : > { %v502_v16 = vadd.f32 %v1330_v22, %v501_v14  ;;  %v653_v17 = vadd.f32 %v1330_v22, %v652_v15 }
 0x1b0   : > { %544 = vst.msk [vmem:[%s1334_s5 + $0x1a8] sm:$0xff] %vm516_vm2, %v502_v16 }
 0x1b1   : > { %921 = vst.msk [vmem:[%s1334_s5 + $0x1b8] sm:$0xff] %vm516_vm2, %v653_v17  ;;  %v266_v18 = vpop.trf.xlu0 }
 0x1b2   : > { %841 = vmatmul.msk.f32.gmra.mxu0 %vm302_vm1, %v266_v18  ;;  %874 = vmatmul.msk.f32.gmra.mxu1 %vm302_vm1, %v266_v18 }
 0x1b5   : > { %v504_v19 = vpop.f32.mrf.mxu2  ;;  %v655_v20 = vpop.f32.mrf.mxu3 }
 0x1b6   : > { %v505_v21 = vadd.f32 %v1330_v22, %v504_v19  ;;  %v656_v23 = vadd.f32 %v1330_v22, %v655_v20 }
 0x1b8   : > { %545 = vst.msk [vmem:[%s1334_s5 + $0x1c0] sm:$0xff] %vm516_vm2, %v505_v21 }
 0x1b9   : > { %922 = vst.msk [vmem:[%s1334_s5 + $0x1d0] sm:$0xff] %vm516_vm2, %v656_v23  ;;  %v267_v24 = vpop.trf.xlu0 }
 0x1ba   : > { %842 = vmatmul.msk.f32.gmra.mxu0 %vm302_vm1, %v267_v24  ;;  %875 = vmatmul.msk.f32.gmra.mxu1 %vm302_vm1, %v267_v24 }
 0x1bd   : > { %v507_v25 = vpop.f32.mrf.mxu2  ;;  %v658_v26 = vpop.f32.mrf.mxu3 }
 0x1be   : > { %v508_v27 = vadd.f32 %v1330_v22, %v507_v25  ;;  %v659_v28 = vadd.f32 %v1330_v22, %v658_v26 }
 0x1c0   : > { %546 = vst.msk [vmem:[%s1334_s5 + $0x1c8] sm:$0xff] %vm516_vm2, %v508_v27 }
 0x1c1   : > { %923 = vst.msk [vmem:[%s1334_s5 + $0x1d8] sm:$0xff] %vm516_vm2, %v659_v28  ;;  %v268_v29 = vpop.trf.xlu0 }
 0x1c2   : > { %843 = vmatmul.msk.f32.gmra.mxu0 %vm302_vm1, %v268_v29  ;;  %876 = vmatmul.msk.f32.gmra.mxu1 %vm302_vm1, %v268_v29 }
 0x1c5   : > { %v510_v30 = vpop.f32.mrf.mxu2  ;;  %v661_v31 = vpop.f32.mrf.mxu3 }
 0x1c6   : > { %v511_v32 = vadd.f32 %v1330_v22, %v510_v30  ;;  %v662_v33 = vadd.f32 %v1330_v22, %v661_v31 }
 0x1c8   : > { %547 = vst.msk [vmem:[%s1334_s5 + $0x1e0] sm:$0xff] %vm516_vm2, %v511_v32 }
 0x1c9   : > { %924 = vst.msk [vmem:[%s1334_s5 + $0x1f0] sm:$0xff] %vm516_vm2, %v662_v33  ;;  %v269_v34 = vpop.trf.xlu0 }
 0x1ca   : > { %844 = vmatmul.msk.f32.gmra.mxu0 %vm302_vm1, %v269_v34  ;;  %877 = vmatmul.msk.f32.gmra.mxu1 %vm302_vm1, %v269_v34 }
 0x1cd   : > { %v513_v35 = vpop.f32.mrf.mxu2  ;;  %v664_v36 = vpop.f32.mrf.mxu3 }
 0x1ce   : > { %v514_v37 = vadd.f32 %v1330_v22, %v513_v35  ;;  %v665_v38 = vadd.f32 %v1330_v22, %v664_v36 }
 0x1cf   : > { %v420_v39 = vpop.f32.mrf.mxu0  ;;  %v571_v40 = vpop.f32.mrf.mxu1 }
 0x1d0   : > { %548 = vst.msk [vmem:[%s1334_s5 + $0x1e8] sm:$0xff] %vm516_vm2, %v514_v37  ;;  %v421_v41 = vadd.f32 %v1330_v22, %v420_v39  ;;  %v572_v42 = vadd.f32 %v1330_v22, %v571_v40 }
 0x1d1   : > { %925 = vst.msk [vmem:[%s1334_s5 + $0x1f8] sm:$0xff] %vm516_vm2, %v665_v38 }
 0x1d2   : > { %517 = vst.msk [vmem:[%s1334_s5] sm:$0xff] %vm516_vm2, %v421_v41 }
 0x1d3   : > { %894 = vst.msk [vmem:[%s1334_s5 + $0x10] sm:$0xff] %vm516_vm2, %v572_v42 }
 0x1d7   : > { %v423_v43 = vpop.f32.mrf.mxu0  ;;  %v574_v44 = vpop.f32.mrf.mxu1 }
 0x1d8   : > { %v424_v45 = vadd.f32 %v1330_v22, %v423_v43  ;;  %v575_v46 = vadd.f32 %v1330_v22, %v574_v44 }
 0x1da   : > { %518 = vst.msk [vmem:[%s1334_s5 + $0x8] sm:$0xff] %vm516_vm2, %v424_v45 }
 0x1db   : > { %895 = vst.msk [vmem:[%s1334_s5 + $0x18] sm:$0xff] %vm516_vm2, %v575_v46 }
 0x1df   : > { %v426_v47 = vpop.f32.mrf.mxu0  ;;  %v577_v48 = vpop.f32.mrf.mxu1 }
 0x1e0   : > { %v427_v49 = vadd.f32 %v1330_v22, %v426_v47  ;;  %v578_v50 = vadd.f32 %v1330_v22, %v577_v48 }
 0x1e2   : > { %519 = vst.msk [vmem:[%s1334_s5 + $0x20] sm:$0xff] %vm516_vm2, %v427_v49 }
 0x1e3   : > { %896 = vst.msk [vmem:[%s1334_s5 + $0x30] sm:$0xff] %vm516_vm2, %v578_v50 }
 0x1e7   : > { %v429_v51 = vpop.f32.mrf.mxu0  ;;  %v580_v52 = vpop.f32.mrf.mxu1 }
 0x1e8   : > { %v430_v53 = vadd.f32 %v1330_v22, %v429_v51  ;;  %v581_v54 = vadd.f32 %v1330_v22, %v580_v52 }
 0x1ea   : > { %520 = vst.msk [vmem:[%s1334_s5 + $0x28] sm:$0xff] %vm516_vm2, %v430_v53 }
 0x1eb   : > { %897 = vst.msk [vmem:[%s1334_s5 + $0x38] sm:$0xff] %vm516_vm2, %v581_v54 }
 0x1ef   : > { %v432_v55 = vpop.f32.mrf.mxu0  ;;  %v583_v56 = vpop.f32.mrf.mxu1 }
 0x1f0   : > { %v433_v57 = vadd.f32 %v1330_v22, %v432_v55  ;;  %v584_v58 = vadd.f32 %v1330_v22, %v583_v56 }
 0x1f2   : > { %521 = vst.msk [vmem:[%s1334_s5 + $0x40] sm:$0xff] %vm516_vm2, %v433_v57 }
 0x1f3   : > { %898 = vst.msk [vmem:[%s1334_s5 + $0x50] sm:$0xff] %vm516_vm2, %v584_v58 }
 0x1f7   : > { %v435_v59 = vpop.f32.mrf.mxu0  ;;  %v586_v60 = vpop.f32.mrf.mxu1 }
 0x1f8   : > { %v436_v61 = vadd.f32 %v1330_v22, %v435_v59  ;;  %v587_v62 = vadd.f32 %v1330_v22, %v586_v60 }
 0x1fa   : > { %522 = vst.msk [vmem:[%s1334_s5 + $0x48] sm:$0xff] %vm516_vm2, %v436_v61 }
 0x1fb   : > { %899 = vst.msk [vmem:[%s1334_s5 + $0x58] sm:$0xff] %vm516_vm2, %v587_v62 }
 0x1ff   : > { %v438_v63 = vpop.f32.mrf.mxu0  ;;  %v589_v0 = vpop.f32.mrf.mxu1 }
 0x200   : > { %v439_v1 = vadd.f32 %v1330_v22, %v438_v63  ;;  %v590_v2 = vadd.f32 %v1330_v22, %v589_v0 }
 0x202   : > { %523 = vst.msk [vmem:[%s1334_s5 + $0x60] sm:$0xff] %vm516_vm2, %v439_v1 }
 0x203   : > { %900 = vst.msk [vmem:[%s1334_s5 + $0x70] sm:$0xff] %vm516_vm2, %v590_v2 }
 0x207   : > { %v441_v3 = vpop.f32.mrf.mxu0  ;;  %v592_v4 = vpop.f32.mrf.mxu1 }
 0x208   : > { %v442_v5 = vadd.f32 %v1330_v22, %v441_v3  ;;  %v593_v6 = vadd.f32 %v1330_v22, %v592_v4 }
 0x20a   : > { %524 = vst.msk [vmem:[%s1334_s5 + $0x68] sm:$0xff] %vm516_vm2, %v442_v5 }
 0x20b   : > { %901 = vst.msk [vmem:[%s1334_s5 + $0x78] sm:$0xff] %vm516_vm2, %v593_v6 }
 0x20f   : > { %v444_v7 = vpop.f32.mrf.mxu0  ;;  %v595_v8 = vpop.f32.mrf.mxu1 }
 0x210   : > { %v445_v9 = vadd.f32 %v1330_v22, %v444_v7  ;;  %v596_v10 = vadd.f32 %v1330_v22, %v595_v8 }
 0x212   : > { %525 = vst.msk [vmem:[%s1334_s5 + $0x80] sm:$0xff] %vm516_vm2, %v445_v9 }
 0x213   : > { %902 = vst.msk [vmem:[%s1334_s5 + $0x90] sm:$0xff] %vm516_vm2, %v596_v10 }
 0x217   : > { %v447_v11 = vpop.f32.mrf.mxu0  ;;  %v598_v12 = vpop.f32.mrf.mxu1 }
 0x218   : > { %v448_v13 = vadd.f32 %v1330_v22, %v447_v11  ;;  %v599_v14 = vadd.f32 %v1330_v22, %v598_v12 }
 0x21a   : > { %526 = vst.msk [vmem:[%s1334_s5 + $0x88] sm:$0xff] %vm516_vm2, %v448_v13 }
 0x21b   : > { %903 = vst.msk [vmem:[%s1334_s5 + $0x98] sm:$0xff] %vm516_vm2, %v599_v14 }
 0x21f   : > { %v450_v15 = vpop.f32.mrf.mxu0  ;;  %v601_v16 = vpop.f32.mrf.mxu1 }
 0x220   : > { %v451_v17 = vadd.f32 %v1330_v22, %v450_v15  ;;  %v602_v18 = vadd.f32 %v1330_v22, %v601_v16 }
 0x222   : > { %527 = vst.msk [vmem:[%s1334_s5 + $0xa0] sm:$0xff] %vm516_vm2, %v451_v17 }
 0x223   : > { %904 = vst.msk [vmem:[%s1334_s5 + $0xb0] sm:$0xff] %vm516_vm2, %v602_v18 }
 0x227   : > { %v453_v19 = vpop.f32.mrf.mxu0  ;;  %v604_v20 = vpop.f32.mrf.mxu1 }
 0x228   : > { %v454_v21 = vadd.f32 %v1330_v22, %v453_v19  ;;  %v605_v23 = vadd.f32 %v1330_v22, %v604_v20 }
 0x22a   : > { %528 = vst.msk [vmem:[%s1334_s5 + $0xa8] sm:$0xff] %vm516_vm2, %v454_v21 }
 0x22b   : > { %905 = vst.msk [vmem:[%s1334_s5 + $0xb8] sm:$0xff] %vm516_vm2, %v605_v23 }
 0x22f   : > { %v456_v24 = vpop.f32.mrf.mxu0  ;;  %v607_v25 = vpop.f32.mrf.mxu1 }
 0x230   : > { %v457_v26 = vadd.f32 %v1330_v22, %v456_v24  ;;  %v608_v27 = vadd.f32 %v1330_v22, %v607_v25 }
 0x232   : > { %529 = vst.msk [vmem:[%s1334_s5 + $0xc0] sm:$0xff] %vm516_vm2, %v457_v26 }
 0x233   : > { %906 = vst.msk [vmem:[%s1334_s5 + $0xd0] sm:$0xff] %vm516_vm2, %v608_v27 }
 0x237   : > { %v459_v28 = vpop.f32.mrf.mxu0  ;;  %v610_v29 = vpop.f32.mrf.mxu1 }
 0x238   : > { %v460_v30 = vadd.f32 %v1330_v22, %v459_v28  ;;  %v611_v31 = vadd.f32 %v1330_v22, %v610_v29 }
 0x23a   : > { %530 = vst.msk [vmem:[%s1334_s5 + $0xc8] sm:$0xff] %vm516_vm2, %v460_v30 }
 0x23b   : > { %907 = vst.msk [vmem:[%s1334_s5 + $0xd8] sm:$0xff] %vm516_vm2, %v611_v31 }
 0x23f   : > { %v462_v32 = vpop.f32.mrf.mxu0  ;;  %v613_v33 = vpop.f32.mrf.mxu1 }
 0x240   : > { %v463_v34 = vadd.f32 %v1330_v22, %v462_v32  ;;  %v614_v35 = vadd.f32 %v1330_v22, %v613_v33 }
 0x242   : > { %531 = vst.msk [vmem:[%s1334_s5 + $0xe0] sm:$0xff] %vm516_vm2, %v463_v34 }
 0x243   : > { %908 = vst.msk [vmem:[%s1334_s5 + $0xf0] sm:$0xff] %vm516_vm2, %v614_v35 }
 0x247   : > { %v465_v36 = vpop.f32.mrf.mxu0  ;;  %v616_v37 = vpop.f32.mrf.mxu1 }
 0x248   : > { %v466_v38 = vadd.f32 %v1330_v22, %v465_v36  ;;  %v617_v39 = vadd.f32 %v1330_v22, %v616_v37 }
 0x24a   : > { %532 = vst.msk [vmem:[%s1334_s5 + $0xe8] sm:$0xff] %vm516_vm2, %v466_v38 }
 0x24b   : > { %909 = vst.msk [vmem:[%s1334_s5 + $0xf8] sm:$0xff] %vm516_vm2, %v617_v39 }
 0x24c   : > { %1101 = shalt.err (!%p1098_p13)
}
 0x24d   : > { %s1165_s28 = smov 128   ;;  %s1166_s23 = smov 8  }
 0x24e   : > { %941 = dma.vmem_to_hbm [thread:$0]  (%p1258_p4), %s717_s18, 8192, %s719_s24, %s701_s15, %s1165_s28, %s1165_s28, %s1166_s23  }
 0x24f PF: > { %s733_s4 = sand.u32 1, %s1140_s12   ;;  %p952_p0 = pnand %p820_p6, %p1266_p7 }
 0x250   : > { %s734_s5 = scalar_lea.sflag [#allocation4], %s733_s4 }
 0x251   : > { %p953_p2 = pneg %p952_p0 }
 0x253   : > { %1135 = dma.done.wait (%p953_p2), %s734_s5, 8192  }
 0x254   : > { %1137 = vsyncadd (%p953_p2), %s734_s5, 4294959104  ;;  %s20_s17 = sadd.s32 1, %s1160_s17   ;;  %s1605_s12 = smov %s1144_s13 }
 0x255   : > { %p17_p5 = scmp.ge.s32.totalorder %s20_s17, 4   ;;  %s1606_s13 = smov %s1148_s14 }
 0x256   : > { %s1607_s14 = smov %s1264_s8  ;;  %s1608_s15 = smov %s1156_s16 }
 0x257   : > { %s1609_s16 = smov %s1611_s29  ;;  %19 = sbr.rel (!%p17_p5) target bundleno = 7 (0x7), region = 83 }
 0x25c   :  { %740 = vsyncpa [#allocation3], 1 }
 0x25d   :  { %742 = vsyncpa [#allocation3 + $0x1], 1 }
 0x25e   :  { %743 = vsyncpa [#allocation6], 1 }
 0x25f   :  { %744 = vsyncpa [#allocation4], 1 }
 0x260   :  { %746 = vsyncpa [#allocation4 + $0x1], 1 }

</bundles_post_ra>
